<compile_context>
chip_gen: v5e
topology: v5e:2x2
jax: 0.10.0
libtpu: 0.0.40
codegen_flags: <defaults>
</compile_context>

<pallas_src>
import numpy as np
import jax
import jax.numpy as jnp
from jax.experimental import pallas as pl
from jax.experimental.pallas import tpu as pltpu


def _cdiv(a, b):
    return -(-a // b)


def _round_up(a, m):
    return _cdiv(a, m) * m


# ----------------------------------------------------------------------------
# Pallas kernel: one (batch, row-tile) grid point per invocation.
# ----------------------------------------------------------------------------
def _disc_mask_kernel(vals_ref, labels_ref, inst_ref, sem_ref):
    """vals_ref   : VMEM (1, M, 1, 1)  int32  per-sample id table (-1 padded)
       labels_ref : VMEM (1, th, W)    int32  label row-tile
       inst_ref   : VMEM (1, M, th, W) int8   instance masks
       sem_ref    : VMEM (1, C, th, W) int8   semantic one-hot
    """
    lab = labels_ref[...]                     # (1, th, W) int32
    vals = vals_ref[0]                        # (M, 1, 1)  int32

    # Instance masks: ONE broadcast compare + ONE full-block store.
    # Padded id slots hold -1 which never matches (labels assumed >= 0),
    # so they come out all-zero for free.
    inst_ref[0] = (lab == vals).astype(jnp.int8)              # (M, th, W)

    # Semantic one-hot of (label != 0) over C classes: row c = (c == fg).
    C = sem_ref.shape[1]
    fg = (lab != 0).astype(jnp.int32)                          # (1, th, W)
    c_ids = jax.lax.broadcasted_iota(jnp.int32, (C, 1, 1), 0)  # (C, 1, 1)
    sem_ref[0] = (c_ids == fg).astype(jnp.int8)                # (C, th, W)


# ----------------------------------------------------------------------------
# Plain-JAX glue: per-sample distinct nonzero ids.
# Branchless bitmask presence reduction instead of a serializing scatter-max.
# ----------------------------------------------------------------------------
def _instance_id_table(labels_flat, max_n_objects, num_ids):
    """Returns (vals (M,) int32 ascending distinct nonzero ids padded with -1,
                n     ()  int32 count clamped to max_n_objects).
    Assumes instance ids live in [0, num_ids); ids outside that range (or
    negative) are dropped from the table but still count as foreground in the
    semantic mask.
    """
    n_words = _cdiv(num_ids, 32)
    word_idx = labels_flat >> 5                                   # (N,)
    bitval = jnp.uint32(1) << (labels_flat & 31).astype(jnp.uint32)
    words = jnp.arange(n_words, dtype=jnp.int32)
    # (N, n_words) uint32: each pixel contributes exactly one set bit in the
    # word holding its label; OR-reduce over pixels gives the presence bitmask.
    contrib = jnp.where(word_idx[:, None] == words[None, :],
                        bitval[:, None], jnp.uint32(0))
    presence_words = jax.lax.reduce(contrib, jnp.array(0, dtype=jnp.uint32),
                                    jax.lax.bitwise_or, (0,))     # (n_words,)
    bits = jnp.arange(32, dtype=jnp.uint32)
    presence = ((presence_words[:, None] >> bits[None, :]) & jnp.uint32(1))
    presence = presence.reshape(n_words * 32)[:num_ids].astype(jnp.int32)

    ids = jnp.arange(num_ids, dtype=jnp.int32)
    present = (presence > 0) & (ids > 0)                          # drop bg 0
    n_total = jnp.sum(present).astype(jnp.int32)

    # m-th (0-based) present id = first index where cumsum(present) == m + 1.
    csum = jnp.cumsum(present.astype(jnp.int32))
    queries = jnp.arange(1, max_n_objects + 1, dtype=jnp.int32)
    pos = jnp.searchsorted(csum, queries, side="left").astype(jnp.int32)
    slot = jnp.arange(max_n_objects, dtype=jnp.int32)
    vals = jnp.where(slot < n_total, jnp.clip(pos, 0, num_ids - 1),
                     jnp.int32(-1)).astype(jnp.int32)

    # NOTE: > max_n_objects distinct ids -> keep the first max_n_objects and
    # clamp n (the PyTorch reference would produce an inconsistent batch).
    n = jnp.minimum(n_total, jnp.int32(max_n_objects))
    return vals, n


# ----------------------------------------------------------------------------
# Wrapper
# ----------------------------------------------------------------------------
def discriminative_mask(labels, max_n_objects=25, sem_class=2, num_ids=256,
                        vmem_budget_bytes=32 * 1024 * 1024):
    """JAX/Pallas equivalent of Discriminative_Mask.forward.

    Returns (instance_mask (B,M,H,W) int8, sem_one_hot (B,C,H,W) int8,
             n_objects (B,) int32).
    """
    labels = jnp.asarray(labels).astype(jnp.int32)
    B, H, W = labels.shape
    M, C = int(max_n_objects), int(sem_class)

    # ---- glue: per-sample instance-id table + object count --------------------
    labels_flat = labels.reshape(B, H * W)
    vals, n_objects = jax.vmap(
        lambda lf: _instance_id_table(lf, M, num_ids))(labels_flat)
    vals4 = vals.reshape(B, M, 1, 1)   # each id in its own (1,1) tile -> cheap splat

    # ---- row-tile selection with padded VMEM accounting -----------------------
    # int8 tiles pad sublanes to 32, int32 to 8; lanes pad to 128; x2 buffers.
    wp = _round_up(W, 128)

    def blk_bytes(th):
        return ((M + C) * _round_up(th, 32) * wp     # int8 outputs
                + 4 * _round_up(th, 8) * wp)         # int32 label tile

    cands = sorted({d for d in range(32, H + 1, 32) if H % d == 0} | {H})
    ok = [d for d in cands if 2 * blk_bytes(d) <= vmem_budget_bytes]
    th = max(ok) if ok else min(cands)
    if B == 1:
        # Keep >= 2 grid steps so both v7x TensorCores get work.
        two = [d for d in ok if H // d >= 2]
        if two:
            th = max(two)
    n_h_tiles = H // th
    vmem_limit = int(min(40 * 1024 * 1024,
                         max(16 * 1024 * 1024, 2 * blk_bytes(th) + (2 << 20))))

    grid_spec = pltpu.PrefetchScalarGridSpec(
        num_scalar_prefetch=0,
        grid=(B, n_h_tiles),
        in_specs=[
            pl.BlockSpec((1, M, 1, 1), lambda b, t: (b, 0, 0, 0)),   # id table
            pl.BlockSpec((1, th, W), lambda b, t: (b, t, 0)),        # label tile
        ],
        out_specs=[
            pl.BlockSpec((1, M, th, W), lambda b, t: (b, 0, t, 0)),  # instance
            pl.BlockSpec((1, C, th, W), lambda b, t: (b, 0, t, 0)),  # semantic
        ],
    )

    inst_mask, sem_one_hot = pl.pallas_call(
        _disc_mask_kernel,
        grid_spec=grid_spec,
        out_shape=(
            jax.ShapeDtypeStruct((B, M, H, W), jnp.int8),
            jax.ShapeDtypeStruct((B, C, H, W), jnp.int8),
        ),
        compiler_params=pltpu.CompilerParams(
            dimension_semantics=("parallel", "parallel"),
            vmem_limit_bytes=vmem_limit),
    )(vals4, labels)

    return inst_mask, sem_one_hot, n_objects


# ----------------------------------------------------------------------------
# NumPy reference of the PyTorch semantics (for the sanity check)
# ----------------------------------------------------------------------------
def _numpy_reference(labels_np, max_n_objects, sem_class):
    B, H, W = labels_np.shape
    inst = np.zeros((B, max_n_objects, H, W), np.int32)
    sem = np.zeros((B, sem_class, H, W), np.int32)
    n = np.zeros((B,), np.int32)
    for b in range(B):
        vals = sorted(set(np.unique(labels_np[b])) - {0})
        n[b] = len(vals)
        for l, v in enumerate(vals):
            inst[b, l] = (labels_np[b] == v).astype(np.int32)
        semm = (labels_np[b] != 0).astype(np.int64)
        one_hot = np.eye(sem_class, dtype=np.int32)[semm]  # (H, W, C)
        sem[b] = one_hot.transpose(2, 0, 1)
    return inst, sem, n


if __name__ == "__main__":
    B, H, W = 2, 16, 16
    MAX_N_OBJECTS, SEM_CLASS = 8, 2

    key = jax.random.PRNGKey(0)
    labels = jax.random.randint(key, (B, H, W), 0, 6, dtype=jnp.int32)

    fn = jax.jit(lambda lab: discriminative_mask(
        lab, max_n_objects=MAX_N_OBJECTS, sem_class=SEM_CLASS))
    inst_mask, sem_one_hot, n_objects = fn(labels)
    jax.block_until_ready((inst_mask, sem_one_hot, n_objects))

    # sanity check vs. numpy reference of the PyTorch semantics
    labels_np = np.asarray(labels)
    ref_inst, ref_sem, ref_n = _numpy_reference(labels_np, MAX_N_OBJECTS, SEM_CLASS)
    np.testing.assert_array_equal(np.asarray(inst_mask).astype(np.int32), ref_inst)
    np.testing.assert_array_equal(np.asarray(sem_one_hot).astype(np.int32), ref_sem)
    np.testing.assert_array_equal(np.asarray(n_objects), ref_n)

    print("KERNEL_OK")
</pallas_src>

<mosaic_0001>
module attributes {stable_mosaic.version = 11 : i64} {
  func.func @_disc_mask_kernel(%arg0: i32, %arg1: i32, %arg2: memref<1x8x1x1xi32, #tpu.memory_space<vmem>>, %arg3: memref<1x16x16xi32, #tpu.memory_space<vmem>>, %arg4: memref<1x8x16x16xi8, #tpu.memory_space<vmem>>, %arg5: memref<1x2x16x16xi8, #tpu.memory_space<vmem>>) attributes {dimension_semantics = [#tpu.dimension_semantics<parallel>, #tpu.dimension_semantics<parallel>], iteration_bounds = array<i64: 2, 1>, scalar_prefetch = 0 : i64, scratch_operands = 0 : i64, tpu.core_type = #tpu.core_type<tc>, window_params = [{transform_indices = @transform_0, window_bounds = array<i64: 1, 8, 1, 1>}, {transform_indices = @transform_1, window_bounds = array<i64: 1, 16, 16>}, {transform_indices = @transform_2, window_bounds = array<i64: 1, 8, 16, 16>}, {transform_indices = @transform_3, window_bounds = array<i64: 1, 2, 16, 16>}]} {
    %c0 = arith.constant 0 : index
    %c0_0 = arith.constant 0 : index
    %c0_1 = arith.constant 0 : index
    %0 = vector.load %arg3[%c0, %c0_0, %c0_1] : memref<1x16x16xi32, #tpu.memory_space<vmem>>, vector<1x16x16xi32>
    %c0_2 = arith.constant 0 : index
    %c0_3 = arith.constant 0 : index
    %c0_4 = arith.constant 0 : index
    %c0_5 = arith.constant 0 : index
    %1 = vector.load %arg2[%c0_2, %c0_3, %c0_4, %c0_5] : memref<1x8x1x1xi32, #tpu.memory_space<vmem>>, vector<1x8x1x1xi32>
    %2 = vector.shape_cast %1 : vector<1x8x1x1xi32> to vector<8x1x1xi32>
    %3 = vector.broadcast %0 : vector<1x16x16xi32> to vector<8x16x16xi32>
    %4 = vector.broadcast %2 : vector<8x1x1xi32> to vector<8x16x16xi32>
    %5 = arith.cmpi eq, %3, %4 : vector<8x16x16xi32>
    %6 = arith.extui %5 : vector<8x16x16xi1> to vector<8x16x16xi8>
    %c0_6 = arith.constant 0 : index
    %c0_7 = arith.constant 0 : index
    %c0_8 = arith.constant 0 : index
    %c0_9 = arith.constant 0 : index
    %7 = vector.load %arg4[%c0_6, %c0_7, %c0_8, %c0_9] : memref<1x8x16x16xi8, #tpu.memory_space<vmem>>, vector<1x8x16x16xi8>
    %8 = vector.shape_cast %7 : vector<1x8x16x16xi8> to vector<8x16x16xi8>
    %9 = vector.shape_cast %6 : vector<8x16x16xi8> to vector<1x8x16x16xi8>
    tpu.vector_store %arg4[%c0_6, %c0_7, %c0_8, %c0_9], %9 {strides = array<i32>} : memref<1x8x16x16xi8, #tpu.memory_space<vmem>>, vector<1x8x16x16xi8>,
    %c0_i32 = arith.constant 0 : i32
    %10 = vector.broadcast %c0_i32 : i32 to vector<1x16x16xi32>
    %11 = arith.cmpi ne, %0, %10 : vector<1x16x16xi32>
    %12 = arith.extui %11 : vector<1x16x16xi1> to vector<1x16x16xi32>
    %13 = tpu.iota {dimensions = array<i32: 0>} : vector<2x1x1xi32>
    %14 = vector.broadcast %13 : vector<2x1x1xi32> to vector<2x16x16xi32>
    %15 = vector.broadcast %12 : vector<1x16x16xi32> to vector<2x16x16xi32>
    %16 = arith.cmpi eq, %14, %15 : vector<2x16x16xi32>
    %17 = arith.extui %16 : vector<2x16x16xi1> to vector<2x16x16xi8>
    %c0_10 = arith.constant 0 : index
    %c0_11 = arith.constant 0 : index
    %c0_12 = arith.constant 0 : index
    %c0_13 = arith.constant 0 : index
    %18 = vector.load %arg5[%c0_10, %c0_11, %c0_12, %c0_13] : memref<1x2x16x16xi8, #tpu.memory_space<vmem>>, vector<1x2x16x16xi8>
    %19 = vector.shape_cast %18 : vector<1x2x16x16xi8> to vector<2x16x16xi8>
    %20 = vector.shape_cast %17 : vector<2x16x16xi8> to vector<1x2x16x16xi8>
    tpu.vector_store %arg5[%c0_10, %c0_11, %c0_12, %c0_13], %20 {strides = array<i32>} : memref<1x2x16x16xi8, #tpu.memory_space<vmem>>, vector<1x2x16x16xi8>,
    return
  }
  func.func @transform_0(%arg0: i32, %arg1: i32) -> (i32, i32, i32, i32) {
    %c0_i32 = arith.constant 0 : i32
    %c0_i32_0 = arith.constant 0 : i32
    %c0_i32_1 = arith.constant 0 : i32
    %c0_i32_2 = arith.constant 0 : i32
    return %arg0, %c0_i32, %c0_i32_0, %c0_i32_1 : i32, i32, i32, i32
  }
  func.func @transform_1(%arg0: i32, %arg1: i32) -> (i32, i32, i32) {
    %c0_i32 = arith.constant 0 : i32
    %c0_i32_0 = arith.constant 0 : i32
    return %arg0, %arg1, %c0_i32 : i32, i32, i32
  }
  func.func @transform_2(%arg0: i32, %arg1: i32) -> (i32, i32, i32, i32) {
    %c0_i32 = arith.constant 0 : i32
    %c0_i32_0 = arith.constant 0 : i32
    %c0_i32_1 = arith.constant 0 : i32
    return %arg0, %c0_i32, %arg1, %c0_i32_0 : i32, i32, i32, i32
  }
  func.func @transform_3(%arg0: i32, %arg1: i32) -> (i32, i32, i32, i32) {
    %c0_i32 = arith.constant 0 : i32
    %c0_i32_0 = arith.constant 0 : i32
    %c0_i32_1 = arith.constant 0 : i32
    return %arg0, %c0_i32, %arg1, %c0_i32_0 : i32, i32, i32, i32
  }
}

</mosaic_0001>

<bundles_post_ra>
// kernel: custom-call.3
= control target key start
LH: loop header
LB: loop body
LE: loop exit
PB: predicated region body
PF: predicated region fallthrough
CT: control target
= control target key end

     0   :  { %s6_s0 = inlined_call_operand.vmem [shape: u32[2,8], index: 0, kind: output, shape index: {}]  }

// kernel: squeeze.7
= control target key start
LH: loop header
LB: loop body
LE: loop exit
PB: predicated region body
PF: predicated region fallthrough
CT: control target
= control target key end

     0   :  { %vm7_vm0 = vcmask 64512   ;;  %s39_s0 = inlined_call_operand.vmem [shape: s32[16], index: 0, kind: input, shape index: {}]   ;;  %s40_s1 = inlined_call_operand.vmem [shape: s32[2,8], index: 1, kind: output, shape index: {}]  }
   0x1   :  { %v4_v0 = vld [vmem:[%s39_s0] sm:$0x1]  ;;  %s22_s0 = smov 120  }
   0x2   :  { %5 = vst [vmem:[#allocation1] sm:$0x1] %v4_v0 }
   0x9   :  { %v9_v1 = vld [vmem:[#allocation1] sm:$0x1]  }
   0xa   :  { %v6_v2 = vld [vmem:[#allocation1] sm:$0x1]   ;;  %10 = vrot.lane.b32.xlu0 %v9_v1, %s22_s0 }
   0xb   :  { %8 = vst.msk [vmem:[#allocation0] sm:$0x1] %vm7_vm0, %v6_v2  }
  0x7c   :  { %v11_v3 = vpop.permute.xlu0 %10  }
  0x7d   :  { %14 = vst.msk [vmem:[#allocation0 + $0x1] sm:$0x1] %vm7_vm0, %v11_v3  }
  0x84   :  { %v17_v4 = vld [vmem:[#allocation0] sm:$0x3] }
  0x85   :  { %20 = vst [vmem:[%s40_s1] sm:$0x3] %v17_v4 }

// kernel: _lambda_.1
= control target key start
LH: loop header
LB: loop body
LE: loop exit
PB: predicated region body
PF: predicated region fallthrough
CT: control target
= control target key end

     0   :  { %9 = vsyncpa [#allocation3], 0  ;;  %s1069_s0 = inlined_call_operand.vmem [shape: s32[2,8,1,1], index: 0, kind: input, shape index: {}]   ;;  %s1070_s1 = inlined_call_operand.vmem [shape: s32[2,16,16], index: 1, kind: input, shape index: {}]   ;;  %s1071_s2 = inlined_call_operand.hbm [shape: s8[2,8,16,16], index: 2, kind: output, shape index: {0}]   ;;  %s1072_s3 = inlined_call_operand.hbm [shape: s8[2,2,16,16], index: 3, kind: output, shape index: {1}]  }
   0x1   :  { %11 = vsyncpa [#allocation3 + $0x1], 0 }
   0x2   :  { %12 = vsyncpa [#allocation5], 0 }
   0x3   :  { %14 = vsyncpa [#allocation5 + $0x1], 0  ;;  %s841_s12 = smov 0   ;;  %s843_s13 = smov 0  }
   0x4   :  { %s845_s14 = smov 0   ;;  %s847_s15 = smov 0  }
   0x5   :  { %s849_s16 = smov 0   ;;  %s851_s17 = smov 0  }
   0x6 LB: > { %s609_s18 = sadd.s32 4294967295, %s816_s17   ;;  %s610_s19 = sadd.s32 4294967294, %s816_s17   ;;  %s816_s17 = sphi %s851_s17, %s20_s17   ;;  %s812_s16 = sphi %s849_s16, %s1079_s16   ;;  %s808_s15 = sphi %s847_s15, %s1078_s15   ;;  %s804_s14 = sphi %s845_s14, %s1077_s14   ;;  %s800_s13 = sphi %s843_s13, %s1076_s13   ;;  %s796_s12 = sphi %s841_s12, %s1075_s12  }
   0x7   : > { %s32_s20 = sadd.s32 1, %s812_s16  ;;  %s95_s21 = sadd.s32 1, %s804_s14 }
   0x8   : > { %p34_p0 = scmp.ge.s32.totalorder %s32_s20, 2  ;;  %p105_p1 = scmp.ne.s32.totalorder %s804_s14, %s800_s13 }
   0x9   : > { %p106_p2 = scmp.eq.s32.totalorder %s609_s18, 1  ;;  %p111_p3 = scmp.ne.s32.totalorder %s800_s13, %s796_s12 }
   0xa   : > { %s1081_s20 = smov (%p34_p0, %s32_s20), 0  ;;  %p112_p5 = scmp.eq.s32.totalorder %s610_s19, 1 }
   0xb   : > { %p881_p4 = por %p106_p2, %p105_p1  ;;  %s90_s23 = ssub.s32 %s812_s16, %s1081_s20 }
   0xc   : > { %p613_p6 = scmp.ge.s32.totalorder %s816_s17, 1  ;;  %p93_p7 = scmp.eq.s32.totalorder %s90_s23, 0 }
   0xd   : > { %p888_p8 = por %p112_p5, %p111_p3  ;;  %p178_p9 = scmp.lt.s32.totalorder %s816_s17, 3 }
   0xe   : > { %s894_s25 = scalar_select %p93_p7, %s804_s14, %s95_s21  }
   0xf   : > { %p179_p10 = pnand %p613_p6, %p178_p9 }
  0x10   : > { %p215_p11 = scmp.lt.s32.totalorder (!%p179_p10), %s808_s15, 1  ;;  %s915_s8 = sand.u32 (!%p179_p10), 1, %s800_s13  }
  0x11   : > { %182 = sbr.rel (%p179_p10) target bundleno = 178 (0xb2), region = 28  ;;  %s614_s9 = sshll.u32 (!%p179_p10), %s915_s8, 5 }
  0x12   : > { %s934_s10 = scalar_lea.vmem (!%p179_p10), [#allocation2], %s614_s9  ;;  %s615_s11 = sshll.u32 (!%p179_p10), %s915_s8, 3 }
  0x13   : > { %s631_s18 = sshll.u32 (!%p179_p10), %s808_s15, 3  ;;  %s446_s29 = scalar_lea.sflag (!%p179_p10), [#allocation5], %s915_s8 }
  0x14   : > { %s948_s23 = scalar_lea.hbm (!%p179_p10), %s1072_s3, %s631_s18 }
  0x15   : > { %s481_s28 = sshll.u32 (!%p179_p10), %s948_s23, 4  ;;  %s965_s28 = int_to_ptr.hbm [resolvable:$true] %s481_s28 }
  0x16   : > { %v818_v0 = vmov 0   ;;  %s216_s26 = scalar_select %p215_p11, %s808_s15, 1  ;;  %vm387_vm13 = vcmask 123904  }
  0x17   : > { %696 = vset.pattern.permute.xlu1 %v818_v0  ;;  %695 = vset.pattern.permute.xlu0 %v818_v0 }
  0x18   : > { %697 = vset.pattern.permute.xlu2 %v818_v0  ;;  %s616_s27 = sshll.u32 %s216_s26, 3  ;;  %s629_s4 = sshll.u32 %s216_s26, 4 }
  0x19   : > { %s218_s30 = scalar_lea.vmem %s1069_s0, %s616_s27  ;;  %s227_s7 = scalar_lea.vmem %s1070_s1, %s629_s4 }
  0x1a   : > { %v698_v1 = vld [vmem:[%s218_s30 + $0x2] ss:$0 sm:$0xff]  ;;  %v699_v2 = vld [vmem:[%s218_s30] ss:$0 sm:$0xff]  ;;  %v704_v3 = vld [vmem:[%s218_s30 + $0x4] ss:$0 sm:$0xff] }
  0x1b   : > { %258 = vperm.xlu1 %696, %v698_v1   ;;  %252 = vperm.xlu0 %695, %v699_v2   ;;  %v700_v4 = vld [vmem:[%s218_s30 + $0x3] ss:$0 sm:$0xff]  ;;  %v701_v5 = vld [vmem:[%s218_s30 + $0x1] ss:$0 sm:$0xff]  ;;  %v705_v6 = vld [vmem:[%s218_s30 + $0x5] ss:$0 sm:$0xff] }
  0x1c   : > { %264 = vperm.xlu2 %697, %v704_v3   ;;  %v702_v7 = vld [vmem:[%s218_s30 + $0x7] ss:$0 sm:$0xff]  ;;  %v703_v8 = vld [vmem:[%s218_s30 + $0x6] ss:$0 sm:$0xff]  ;;  %v909_v10 = vld [vmem:[%s227_s7 + $0x8] sm:$0xff]  ;;  %s214_s26 = scalar_lea.vmem [#allocation4], %s615_s11 }
  0x1d   : > { %v907_v9 = vld [vmem:[%s227_s7] sm:$0xff]  ;;  %vm405_vm5 = vcmp.ne.s32.totalorder %v909_v10, 0  ;;  %s479_s27 = sshll.u32 %s214_s26, 4  ;;  %s720_s30 = sshra.s32 %s965_s28, 4  ;;  %s963_s27 = int_to_ptr.vmem [resolvable:$true] %s479_s27  ;;  %s721_s30 = int_to_ptr.hbm [resolvable:$true] %s720_s30 }
  0x1e   : > { %vm404_vm4 = vcmp.ne.s32.totalorder %v907_v9, 0  ;;  %vm620_vm9 = vmneg %vm405_vm5  ;;  %s722_s4 = scalar_lea.hbm %s721_s30, 8  ;;  %s726_s7 = scalar_lea.hbm %s1072_s3, 16 }
  0x1f   : > { %vm619_vm6 = vmneg %vm404_vm4  ;;  %p723_p12 = scmp.ne.s32.totalorder %s721_s30, %s722_s4  ;;  %p727_p1 = scmp.lt.s32.totalorder %s721_s30, %s1072_s3 }
  0x20   : > { %vm412_vm11 = vmpackc.low %vm620_vm9, %vm619_vm6  ;;  %p728_p2 = scmp.lt.s32.totalorder %s726_s7, %s722_s4 }
  0x21   : > { %v413_v24 = vsel %vm412_vm11, 16711935, %v818_v0  ;;  %vm417_vm12 = vmpackc.low %vm405_vm5, %vm404_vm4  ;;  %p724_p13 = pnand %p723_p12, %p881_p4 }
  0x22   : > { %v415_v25 = vpack.c.b8 %v413_v24, %v413_v24  ;;  %v418_v26 = vsel %vm417_vm12, 16711935, %v818_v0  ;;  %p729_p3 = por %p728_p2, %p727_p1 }
  0x23   : > { %261 = vperm.xlu1 %696, %v700_v4   ;;  %255 = vperm.xlu0 %695, %v701_v5   ;;  %v420_v27 = vpack.c.b8 %v418_v26, %v418_v26  ;;  %p725_p0 = pneg %p724_p13 }
  0x24   : > { %267 = vperm.xlu2 %697, %v705_v6   ;;  %vm416_vm15 = vnez %v415_v25 }
  0x25   : > { %v422_v31 = vsel %vm416_vm15, 16843009, %v818_v0  ;;  %p730_p5 = pnand %p729_p3, %p725_p0 }
  0x26   : > { %v424_v33 = vunpack.c.0.s8 %v422_v31  ;;  %v425_v34 = vunpack.c.1.s8 %v422_v31 }
  0x28   : > { %v428_v39 = vpack.c.b16 %v424_v33, %v424_v33  ;;  %v430_v40 = vpack.c.b16 %v425_v34, %v425_v34 }
  0x2a   : > { %v429_v47 = vpack.c.b8 %v428_v39, %v428_v39  ;;  %v431_v48 = vpack.c.b8 %v430_v40, %v430_v40 }
  0x2b   : > { %273 = vperm.xlu1 %696, %v702_v7   ;;  %270 = vperm.xlu0 %695, %v703_v8  }
  0x2c   : > { %436 = vst.msk [vmem:[%s214_s26] sm:$0x3] %vm387_vm13, %v429_v47 }
  0x2d   : > { %437 = vst.msk [vmem:[%s214_s26 + $0x2] sm:$0x3] %vm387_vm13, %v431_v48 }
  0x76   : > { %v265_v11 = vpop.permute.xlu2 %264 }
  0x77   : > { %vm283_vm0 = vcmp.eq.s32.totalorder %v907_v9, %v265_v11  ;;  %vm284_vm1 = vcmp.eq.s32.totalorder %v909_v10, %v265_v11 }
  0x78   : > { %vm311_vm2 = vmpackc.low %vm284_vm1, %vm283_vm0  ;;  %vm421_vm0 = vnez %v420_v27 }
  0x79   : > { %v312_v12 = vsel %vm311_vm2, 16711935, %v818_v0  ;;  %v423_v32 = vsel %vm421_vm0, 16843009, %v818_v0 }
  0x7a   : > { %v314_v13 = vpack.c.b8 %v312_v12, %v312_v12  ;;  %v426_v37 = vunpack.c.0.s8 %v423_v32  ;;  %v427_v38 = vunpack.c.1.s8 %v423_v32 }
  0x7c   : > { %vm315_vm3 = vnez %v314_v13  ;;  %v432_v44 = vpack.c.b16 %v426_v37, %v426_v37  ;;  %v434_v45 = vpack.c.b16 %v427_v38, %v427_v38 }
  0x7d   : > { %v335_v14 = vsel %vm315_vm3, 16843009, %v818_v0 }
  0x7e   : > { %v347_v15 = vunpack.c.0.s8 %v335_v14  ;;  %v348_v16 = vunpack.c.1.s8 %v335_v14  ;;  %v268_v17 = vpop.permute.xlu2 %267  ;;  %v433_v49 = vpack.c.b8 %v432_v44, %v432_v44  ;;  %v435_v51 = vpack.c.b8 %v434_v45, %v434_v45 }
  0x7f   : > { %vm285_vm7 = vcmp.eq.s32.totalorder %v907_v9, %v268_v17  ;;  %vm286_vm8 = vcmp.eq.s32.totalorder %v909_v10, %v268_v17 }
  0x80   : > { %v371_v18 = vpack.c.b16 %v347_v15, %v347_v15  ;;  %v373_v19 = vpack.c.b16 %v348_v16, %v348_v16  ;;  %vm316_vm10 = vmpackc.low %vm286_vm8, %vm285_vm7  ;;  %438 = vst.msk [vmem:[%s214_s26 + $0x4] sm:$0x3] %vm387_vm13, %v433_v49 }
  0x81   : > { %v317_v20 = vsel %vm316_vm10, 16711935, %v818_v0  ;;  %439 = vst.msk [vmem:[%s214_s26 + $0x6] sm:$0x3] %vm387_vm13, %v435_v51 }
  0x82   : > { %v372_v21 = vpack.c.b8 %v371_v18, %v371_v18  ;;  %v374_v22 = vpack.c.b8 %v373_v19, %v373_v19  ;;  %v319_v23 = vpack.c.b8 %v317_v20, %v317_v20 }
  0x84   : > { %396 = vst.msk [vmem:[%s934_s10 + $0x10] sm:$0x3] %vm387_vm13, %v372_v21  ;;  %vm320_vm14 = vnez %v319_v23 }
  0x85   : > { %397 = vst.msk [vmem:[%s934_s10 + $0x12] sm:$0x3] %vm387_vm13, %v374_v22  ;;  %v336_v28 = vsel %vm320_vm14, 16843009, %v818_v0 }
  0x86   : > { %v349_v29 = vunpack.c.0.s8 %v336_v28  ;;  %v350_v30 = vunpack.c.1.s8 %v336_v28 }
  0x88   : > { %v375_v35 = vpack.c.b16 %v349_v29, %v349_v29  ;;  %v377_v36 = vpack.c.b16 %v350_v30, %v350_v30 }
  0x8a   : > { %v376_v42 = vpack.c.b8 %v375_v35, %v375_v35  ;;  %v378_v43 = vpack.c.b8 %v377_v36, %v377_v36 }
  0x8c   : > { %398 = vst.msk [vmem:[%s934_s10 + $0x14] sm:$0x3] %vm387_vm13, %v376_v42 }
  0x8d   : > { %v259_v41 = vpop.permute.xlu1 %258  ;;  %v253_v46 = vpop.permute.xlu0 %252  ;;  %399 = vst.msk [vmem:[%s934_s10 + $0x16] sm:$0x3] %vm387_vm13, %v378_v43 }
  0x8e   : > { %vm279_vm1 = vcmp.eq.s32.totalorder %v907_v9, %v259_v41  ;;  %vm280_vm2 = vcmp.eq.s32.totalorder %v909_v10, %v259_v41  ;;  %vm275_vm4 = vcmp.eq.s32.totalorder %v907_v9, %v253_v46  ;;  %vm276_vm5 = vcmp.eq.s32.totalorder %v909_v10, %v253_v46 }
  0x8f   : > { %vm301_vm3 = vmpackc.low %vm280_vm2, %vm279_vm1 }
  0x90   : > { %v302_v50 = vsel %vm301_vm3, 16711935, %v818_v0  ;;  %vm291_vm6 = vmpackc.low %vm276_vm5, %vm275_vm4 }
  0x91   : > { %v304_v52 = vpack.c.b8 %v302_v50, %v302_v50  ;;  %v292_v53 = vsel %vm291_vm6, 16711935, %v818_v0 }
  0x92   : > { %v294_v54 = vpack.c.b8 %v292_v53, %v292_v53 }
  0x93   : > { %vm305_vm7 = vnez %v304_v52 }
  0x94   : > { %v333_v55 = vsel %vm305_vm7, 16843009, %v818_v0  ;;  %vm295_vm8 = vnez %v294_v54 }
  0x95   : > { %v343_v56 = vunpack.c.0.s8 %v333_v55  ;;  %v344_v57 = vunpack.c.1.s8 %v333_v55  ;;  %v331_v58 = vsel %vm295_vm8, 16843009, %v818_v0  ;;  %v262_v59 = vpop.permute.xlu1 %261 }
  0x96   : > { %733 = shalt.err (!%p730_p5)
}
  0x97   : > { %s819_s18 = smov 32   ;;  %s820_s19 = smov 2   ;;  %v339_v60 = vunpack.c.0.s8 %v331_v58  ;;  %v340_v61 = vunpack.c.1.s8 %v331_v58  ;;  %vm281_vm9 = vcmp.eq.s32.totalorder %v907_v9, %v262_v59  ;;  %vm282_vm10 = vcmp.eq.s32.totalorder %v909_v10, %v262_v59  ;;  %v256_v62 = vpop.permute.xlu0 %255 }
  0x98   : > { %633 = dma.vmem_to_hbm [thread:$0]  (%p881_p4), %s963_s27, 128, %s965_s28, %s446_s29, %s819_s18, %s819_s18, %s820_s19   ;;  %v363_v63 = vpack.c.b16 %v343_v56, %v343_v56  ;;  %v365_v1 = vpack.c.b16 %v344_v57, %v344_v57  ;;  %vm306_vm11 = vmpackc.low %vm282_vm10, %vm281_vm9  ;;  %vm277_vm12 = vcmp.eq.s32.totalorder %v907_v9, %v256_v62  ;;  %vm278_vm14 = vcmp.eq.s32.totalorder %v909_v10, %v256_v62 }
  0x99   : > { %v355_v2 = vpack.c.b16 %v339_v60, %v339_v60  ;;  %v357_v3 = vpack.c.b16 %v340_v61, %v340_v61  ;;  %v307_v4 = vsel %vm306_vm11, 16711935, %v818_v0  ;;  %vm296_vm15 = vmpackc.low %vm278_vm14, %vm277_vm12  ;;  %s630_s21 = sshll.u32 %s808_s15, 5  ;;  %s460_s27 = sshll.u32 %s934_s10, 4  ;;  %s461_s27 = int_to_ptr.vmem [resolvable:$true] %s460_s27 }
  0x9a   : > { %v364_v5 = vpack.c.b8 %v363_v63, %v363_v63  ;;  %v366_v6 = vpack.c.b8 %v365_v1, %v365_v1  ;;  %v309_v7 = vpack.c.b8 %v307_v4, %v307_v4  ;;  %v297_v8 = vsel %vm296_vm15, 16711935, %v818_v0  ;;  %s459_s26 = scalar_lea.hbm %s1071_s2, %s630_s21  ;;  %s441_s29 = scalar_lea.sflag [#allocation3], %s915_s8 }
  0x9b   : > { %v356_v11 = vpack.c.b8 %v355_v2, %v355_v2  ;;  %v358_v12 = vpack.c.b8 %v357_v3, %v357_v3  ;;  %v299_v13 = vpack.c.b8 %v297_v8, %v297_v8  ;;  %s462_s28 = sshll.u32 %s459_s26, 4  ;;  %s754_s7 = scalar_lea.hbm %s1071_s2, 64  ;;  %s463_s28 = int_to_ptr.hbm [resolvable:$true] %s462_s28 }
  0x9c   : > { %392 = vst.msk [vmem:[%s934_s10 + $0x8] sm:$0x3] %vm387_vm13, %v364_v5  ;;  %vm310_vm0 = vnez %v309_v7  ;;  %s748_s30 = sshra.s32 %s463_s28, 4  ;;  %s749_s30 = int_to_ptr.hbm [resolvable:$true] %s748_s30 }
  0x9d   : > { %393 = vst.msk [vmem:[%s934_s10 + $0xa] sm:$0x3] %vm387_vm13, %v366_v6  ;;  %v334_v14 = vsel %vm310_vm0, 16843009, %v818_v0  ;;  %vm300_vm1 = vnez %v299_v13  ;;  %v274_v18 = vpop.permute.xlu1 %273  ;;  %s750_s4 = scalar_lea.hbm %s749_s30, 32  ;;  %p755_p10 = scmp.lt.s32.totalorder %s749_s30, %s1071_s2 }
  0x9e   : > { %388 = vst.msk [vmem:[%s934_s10] sm:$0x3] %vm387_vm13, %v356_v11  ;;  %v345_v15 = vunpack.c.0.s8 %v334_v14  ;;  %v346_v16 = vunpack.c.1.s8 %v334_v14  ;;  %v332_v17 = vsel %vm300_vm1, 16843009, %v818_v0  ;;  %vm289_vm2 = vcmp.eq.s32.totalorder %v907_v9, %v274_v18  ;;  %p751_p6 = scmp.ne.s32.totalorder %s749_s30, %s750_s4  ;;  %p756_p11 = scmp.lt.s32.totalorder %s754_s7, %s750_s4 }
  0x9f   : > { %389 = vst.msk [vmem:[%s934_s10 + $0x2] sm:$0x3] %vm387_vm13, %v358_v12  ;;  %v341_v19 = vunpack.c.0.s8 %v332_v17  ;;  %v342_v20 = vunpack.c.1.s8 %v332_v17  ;;  %vm290_vm3 = vcmp.eq.s32.totalorder %v909_v10, %v274_v18  ;;  %v271_v21 = vpop.permute.xlu0 %270 }
  0xa0   : > { %v367_v22 = vpack.c.b16 %v345_v15, %v345_v15  ;;  %v369_v23 = vpack.c.b16 %v346_v16, %v346_v16  ;;  %vm326_vm4 = vmpackc.low %vm290_vm3, %vm289_vm2  ;;  %vm287_vm5 = vcmp.eq.s32.totalorder %v907_v9, %v271_v21  ;;  %vm288_vm6 = vcmp.eq.s32.totalorder %v909_v10, %v271_v21  ;;  %p752_p7 = pnand %p751_p6, %p881_p4  ;;  %p757_p12 = por %p756_p11, %p755_p10 }
  0xa1   : > { %v359_v24 = vpack.c.b16 %v341_v19, %v341_v19  ;;  %v361_v25 = vpack.c.b16 %v342_v20, %v342_v20  ;;  %v327_v26 = vsel %vm326_vm4, 16711935, %v818_v0  ;;  %vm321_vm7 = vmpackc.low %vm288_vm6, %vm287_vm5 }
  0xa2   : > { %v368_v27 = vpack.c.b8 %v367_v22, %v367_v22  ;;  %v370_v28 = vpack.c.b8 %v369_v23, %v369_v23  ;;  %v329_v29 = vpack.c.b8 %v327_v26, %v327_v26  ;;  %v322_v30 = vsel %vm321_vm7, 16711935, %v818_v0  ;;  %p753_p9 = pneg %p752_p7 }
  0xa3   : > { %v360_v31 = vpack.c.b8 %v359_v24, %v359_v24  ;;  %v362_v32 = vpack.c.b8 %v361_v25, %v361_v25  ;;  %v324_v33 = vpack.c.b8 %v322_v30, %v322_v30 }
  0xa4   : > { %394 = vst.msk [vmem:[%s934_s10 + $0xc] sm:$0x3] %vm387_vm13, %v368_v27  ;;  %vm330_vm8 = vnez %v329_v29  ;;  %p758_p13 = pnand %p757_p12, %p753_p9 }
  0xa5   : > { %395 = vst.msk [vmem:[%s934_s10 + $0xe] sm:$0x3] %vm387_vm13, %v370_v28  ;;  %v338_v9 = vsel %vm330_vm8, 16843009, %v818_v0  ;;  %vm325_vm9 = vnez %v324_v33 }
  0xa6   : > { %390 = vst.msk [vmem:[%s934_s10 + $0x4] sm:$0x3] %vm387_vm13, %v360_v31  ;;  %v353_v10 = vunpack.c.0.s8 %v338_v9  ;;  %v354_v34 = vunpack.c.1.s8 %v338_v9  ;;  %v337_v35 = vsel %vm325_vm9, 16843009, %v818_v0 }
  0xa7   : > { %391 = vst.msk [vmem:[%s934_s10 + $0x6] sm:$0x3] %vm387_vm13, %v362_v32  ;;  %v351_v36 = vunpack.c.0.s8 %v337_v35  ;;  %v352_v37 = vunpack.c.1.s8 %v337_v35 }
  0xa8   : > { %v383_v38 = vpack.c.b16 %v353_v10, %v353_v10  ;;  %v385_v39 = vpack.c.b16 %v354_v34, %v354_v34 }
  0xa9   : > { %v379_v40 = vpack.c.b16 %v351_v36, %v351_v36  ;;  %v381_v41 = vpack.c.b16 %v352_v37, %v352_v37 }
  0xaa   : > { %v384_v42 = vpack.c.b8 %v383_v38, %v383_v38  ;;  %v386_v43 = vpack.c.b8 %v385_v39, %v385_v39 }
  0xab   : > { %v380_v0 = vpack.c.b8 %v379_v40, %v379_v40  ;;  %v382_v44 = vpack.c.b8 %v381_v41, %v381_v41 }
  0xac   : > { %402 = vst.msk [vmem:[%s934_s10 + $0x1c] sm:$0x3] %vm387_vm13, %v384_v42 }
  0xad   : > { %403 = vst.msk [vmem:[%s934_s10 + $0x1e] sm:$0x3] %vm387_vm13, %v386_v43 }
  0xae   : > { %400 = vst.msk [vmem:[%s934_s10 + $0x18] sm:$0x3] %vm387_vm13, %v380_v0 }
  0xaf   : > { %401 = vst.msk [vmem:[%s934_s10 + $0x1a] sm:$0x3] %vm387_vm13, %v382_v44 }
  0xb0   : > { %761 = shalt.err (!%p758_p13)
}
  0xb1   : > { %632 = dma.vmem_to_hbm [thread:$0]  (%p881_p4), %s461_s27, 512, %s463_s28, %s441_s29, %s819_s18, %s819_s18, %s820_s19  }
  0xb2 PF: > { %p643_p0 = scmp.ge.s32.totalorder %s816_s17, 2  ;;  %s496_s8 = sand.u32 1, %s796_s12  }
  0xb3   : > { %s497_s10 = scalar_lea.sflag [#allocation3], %s496_s8 }
  0xb4   : > { %p637_p1 = pnand %p643_p0, %p888_p8 }
  0xb6   : > { %p638_p2 = pneg %p637_p1 }
  0xb8   : > { %787 = dma.done.wait (%p638_p2), %s497_s10, 512  }
  0xb9   : > { %789 = vsyncadd (%p638_p2), %s497_s10, 4294966784  ;;  %s507_s21 = scalar_lea.sflag [#allocation5], %s496_s8 }
  0xba   : > { %791 = dma.done.wait (%p638_p2), %s507_s21, 128  }
  0xbb   : > { %793 = vsyncadd (%p638_p2), %s507_s21, 4294967168  ;;  %s20_s17 = sadd.s32 1, %s816_s17   ;;  %s1075_s12 = smov %s800_s13 }
  0xbc   : > { %p17_p3 = scmp.ge.s32.totalorder %s20_s17, 4   ;;  %s1076_s13 = smov %s804_s14 }
  0xbd   : > { %s1077_s14 = smov %s894_s25  ;;  %s1078_s15 = smov %s812_s16 }
  0xbe   : > { %s1079_s16 = smov %s1081_s20  ;;  %19 = sbr.rel (!%p17_p3) target bundleno = 6 (0x6), region = 83 }
  0xc3   :  { %513 = vsyncpa [#allocation3], 1 }
  0xc4   :  { %515 = vsyncpa [#allocation3 + $0x1], 1 }
  0xc5   :  { %516 = vsyncpa [#allocation5], 1 }
  0xc6   :  { %518 = vsyncpa [#allocation5 + $0x1], 1 }

</bundles_post_ra>
